<compile_context>
chip_gen: v7x
topology: tpu7x:2x2x1
jax: 0.10.0
libtpu: 0.0.40
codegen_flags: <defaults>
</compile_context>

<pallas_src>
import functools
import math

import numpy as np
import jax
import jax.numpy as jnp
from jax.experimental import pallas as pl
from jax.experimental.pallas import tpu as pltpu


def _round_up(x, m):
    return ((x + m - 1) // m) * m


def _vmem_limit_bytes():
    cap = None
    try:
        cap = int(getattr(pltpu.get_tpu_info(), "vmem_capacity_bytes", 0)) or None
    except Exception:
        cap = None
    if cap is None:
        cap = 64 * 1024 * 1024          # conservative fallback: fits all gens
    return min(cap // 2, 64 * 1024 * 1024)   # 64 MiB on v5e/v6e, 32 MiB on v7x


def _cosine_loss_kernel(pred_ref, true_ref, sel_ref, out_ref, *, n_packed, tile, pack):
    p = pred_ref[...].astype(jnp.float32)     # (tile, width)
    t = true_ref[...].astype(jnp.float32)
    sel = sel_ref[...]                        # (width, pack), exact 0/1 f32

    # TODO(synk): torch asserts on NaN/Inf in the inputs; there is no clean
    # in-kernel assertion path on TPU, so those checks are omitted.

    # Three per-row segment sums on the MXU.  HIGHEST precision keeps the f32
    # products exact (the 0/1 RHS is bf16-exact, so only the LHS split matters).
    prec = jax.lax.Precision.HIGHEST
    sp = jnp.dot(p * p, sel, preferred_element_type=jnp.float32, precision=prec)
    st = jnp.dot(t * t, sel, preferred_element_type=jnp.float32, precision=prec)
    spt = jnp.dot(p * t, sel, preferred_element_type=jnp.float32, precision=prec)

    # cosine_similarity(p/(||p||+eps), t/(||t||+eps)) == spt / sqrt(sp*st) for
    # every non-degenerate row (identical algebra to torch); one rsqrt per row.
    denom2 = sp * st
    cos = spt * jax.lax.rsqrt(jnp.maximum(denom2, jnp.float32(1e-30)))

    # Mask (a) rows past the true packed-row count in the ragged last tile
    # (their VMEM contents are undefined) and (b) exactly-zero rows (torch -> 0).
    i = pl.program_id(0)
    row_id = jax.lax.broadcasted_iota(jnp.int32, (tile, pack), 0)
    valid = (row_id < (n_packed - i * tile)) & (denom2 > 0.0)
    cos = jnp.where(valid, cos, 0.0)

    # One small partial-sum store per grid step; final reduce is in the wrapper.
    out_ref[...] = jnp.sum(cos, axis=0, keepdims=True).reshape(1, 1, pack)


def cosine_loss(pred, true):
    assert pred.shape == true.shape
    d = pred.shape[-1]
    n = math.prod(pred.shape[:-1]) if pred.ndim > 1 else 1
    pred2 = pred.reshape(n, d)
    true2 = true.reshape(n, d)

    # Lane packing: put `pack` logical rows side by side on the 128-lane axis.
    # Pick the largest pack <= 128//d that divides n so the reshape is free
    # (metadata only) and no padding / extra HBM copy is ever required.
    pack_max = max(1, 128 // d)
    pack = 1
    for cand in range(min(pack_max, n), 0, -1):
        if n % cand == 0:
            pack = cand
            break
    width = pack * d
    n_packed = n // pack
    pred2 = pred2.reshape(n_packed, width)
    true2 = true2.reshape(n_packed, width)

    # Selector: sel[j, k] = 1 iff lane j belongs to packed slot k (built once,
    # stays VMEM-resident across the whole grid via a constant index_map).
    lane_slot = np.arange(width) // d
    sel = jnp.asarray((lane_slot[:, None] == np.arange(pack)[None, :]).astype(np.float32))

    # Row-tile sizing from a generation-aware VMEM budget:
    #   2 inputs x 2 pipeline buffers x tile*width*itemsize
    # + ~4 block-sized f32 temporaries (casts + p*p / t*t / p*t)
    itemsize = jnp.dtype(pred.dtype).itemsize
    vmem_limit = _vmem_limit_bytes()
    bytes_per_packed_row = width * (4 * itemsize + 4 * 4)
    budget_tile = max(8, (int(0.75 * vmem_limit) // bytes_per_packed_row) // 8 * 8)

    if n_packed <= 8:
        num_tiles, tile = 1, n_packed            # block = full first dim
    else:
        # keep >= 2 tiles when possible so both v7x TensorCores get work
        num_tiles = max(2, pl.cdiv(n_packed, budget_tile))
        tile = _round_up(pl.cdiv(n_packed, num_tiles), 8)
        num_tiles = pl.cdiv(n_packed, tile)      # last tile may be ragged

    kernel = functools.partial(_cosine_loss_kernel,
                               n_packed=n_packed, tile=tile, pack=pack)

    cost = pl.CostEstimate(
        flops=8 * n * d,
        transcendentals=n,
        bytes_accessed=2 * n * d * itemsize + num_tiles * pack * 4,
    )

    partials = pl.pallas_call(
        kernel,
        out_shape=jax.ShapeDtypeStruct((num_tiles, 1, pack), jnp.float32),
        grid_spec=pltpu.PrefetchScalarGridSpec(
            num_scalar_prefetch=0,
            grid=(num_tiles,),
            in_specs=[
                pl.BlockSpec((tile, width), lambda i: (i, 0)),
                pl.BlockSpec((tile, width), lambda i: (i, 0)),
                pl.BlockSpec((width, pack), lambda i: (0, 0)),  # resident selector
            ],
            out_specs=pl.BlockSpec((1, 1, pack), lambda i: (i, 0, 0)),
        ),
        compiler_params=pltpu.CompilerParams(
            dimension_semantics=("parallel",),
            vmem_limit_bytes=vmem_limit,
        ),
        cost_estimate=cost,
    )(pred2, true2, sel)

    # Masked / zero rows contribute exactly 0; divide by the true row count.
    return 1.0 - jnp.sum(partials) / n


def _reference(pred, true):
    eps = 1e-8
    norm_p = jnp.linalg.norm(pred, axis=-1, keepdims=True)
    norm_t = jnp.linalg.norm(true, axis=-1, keepdims=True)
    a = pred / (norm_p + eps)
    b = true / (norm_t + eps)
    dot = jnp.sum(a * b, axis=-1)
    na = jnp.linalg.norm(a, axis=-1)
    nb = jnp.linalg.norm(b, axis=-1)
    cos = dot / jnp.maximum(na * nb, eps)
    return 1.0 - jnp.mean(cos)


if __name__ == "__main__":
    key = jax.random.PRNGKey(0)

    # Primary check: shapes consistent with the module (batch=2, seq=8, hidden=32).
    k1, k2 = jax.random.split(key)
    pred = jax.random.normal(k1, (2, 8, 32), dtype=jnp.float32)
    true = jax.random.normal(k2, (2, 8, 32), dtype=jnp.float32)
    loss = cosine_loss(pred, true)
    jax.block_until_ready(loss)
    ref = _reference(pred, true)
    assert jnp.allclose(loss, ref, atol=1e-5, rtol=1e-5), (loss, ref)

    # Ragged row counts (no padding path): odd pack and a masked multi-tile grid.
    k3, k4, k5, k6 = jax.random.split(jax.random.PRNGKey(1), 4)
    p2 = jax.random.normal(k3, (3, 7, 32), dtype=jnp.float32)   # n=21 -> pack=3
    t2 = jax.random.normal(k4, (3, 7, 32), dtype=jnp.float32)
    l2 = cosine_loss(p2, t2)
    jax.block_until_ready(l2)
    assert jnp.allclose(l2, _reference(p2, t2), atol=1e-5, rtol=1e-5), l2

    p3 = jax.random.normal(k5, (5, 5, 32), dtype=jnp.float32)   # n=25 -> pack=1, ragged tile
    t3 = jax.random.normal(k6, (5, 5, 32), dtype=jnp.float32)
    l3 = cosine_loss(p3, t3)
    jax.block_until_ready(l3)
    assert jnp.allclose(l3, _reference(p3, t3), atol=1e-5, rtol=1e-5), l3

    print("KERNEL_OK")
</pallas_src>

<mosaic_0001>
module attributes {stable_mosaic.version = 11 : i64} {
  func.func @_cosine_loss_kernel(%arg0: i32, %arg1: memref<4x128xf32, #tpu.memory_space<vmem>>, %arg2: memref<4x128xf32, #tpu.memory_space<vmem>>, %arg3: memref<128x4xf32, #tpu.memory_space<vmem>>, %arg4: memref<1x1x4xf32, #tpu.memory_space<vmem>>) attributes {dimension_semantics = [#tpu.dimension_semantics<parallel>], iteration_bounds = array<i64: 1>, scalar_prefetch = 0 : i64, scratch_operands = 0 : i64, tpu.core_type = #tpu.core_type<tc>, window_params = [{transform_indices = @transform_0, window_bounds = array<i64: 4, 128>}, {transform_indices = @transform_1, window_bounds = array<i64: 4, 128>}, {pipeline_mode = #tpu.pipeline_mode<synchronous>, transform_indices = @transform_2, window_bounds = array<i64: 128, 4>}, {transform_indices = @transform_3, window_bounds = array<i64: 1, 1, 4>}]} {
    %c0 = arith.constant 0 : index
    %c0_0 = arith.constant 0 : index
    %0 = vector.load %arg1[%c0, %c0_0] : memref<4x128xf32, #tpu.memory_space<vmem>>, vector<4x128xf32>
    %c0_1 = arith.constant 0 : index
    %c0_2 = arith.constant 0 : index
    %1 = vector.load %arg2[%c0_1, %c0_2] : memref<4x128xf32, #tpu.memory_space<vmem>>, vector<4x128xf32>
    %c0_3 = arith.constant 0 : index
    %c0_4 = arith.constant 0 : index
    %2 = vector.load %arg3[%c0_3, %c0_4] : memref<128x4xf32, #tpu.memory_space<vmem>>, vector<128x4xf32>
    %3 = arith.mulf %0, %0 : vector<4x128xf32>
    %cst = arith.constant dense<0.000000e+00> : vector<4x4xf32>
    %4 = tpu.matmul %3, %2, %cst {dimension_numbers = #tpu.dot_dimension_numbers<[1], [0], [0], [1], [0, 0, 1, 1], [], []>, precision = #tpu.contract_precision<fp32>} : vector<4x128xf32>, vector<128x4xf32>, vector<4x4xf32> -> vector<4x4xf32>
    %5 = arith.mulf %1, %1 : vector<4x128xf32>
    %cst_5 = arith.constant dense<0.000000e+00> : vector<4x4xf32>
    %6 = tpu.matmul %5, %2, %cst_5 {dimension_numbers = #tpu.dot_dimension_numbers<[1], [0], [0], [1], [0, 0, 1, 1], [], []>, precision = #tpu.contract_precision<fp32>} : vector<4x128xf32>, vector<128x4xf32>, vector<4x4xf32> -> vector<4x4xf32>
    %7 = arith.mulf %0, %1 : vector<4x128xf32>
    %cst_6 = arith.constant dense<0.000000e+00> : vector<4x4xf32>
    %8 = tpu.matmul %7, %2, %cst_6 {dimension_numbers = #tpu.dot_dimension_numbers<[1], [0], [0], [1], [0, 0, 1, 1], [], []>, precision = #tpu.contract_precision<fp32>} : vector<4x128xf32>, vector<128x4xf32>, vector<4x4xf32> -> vector<4x4xf32>
    %9 = arith.mulf %4, %6 : vector<4x4xf32>
    %cst_7 = arith.constant 1.000000e-30 : f32
    %10 = vector.broadcast %cst_7 : f32 to vector<4x4xf32>
    %11 = arith.maximumf %9, %10 : vector<4x4xf32>
    %12 = math.rsqrt %11 : vector<4x4xf32>
    %13 = arith.mulf %8, %12 : vector<4x4xf32>
    %14 = tpu.iota {dimensions = array<i32: 0>} : vector<4x4xi32>
    %c4_i32 = arith.constant 4 : i32
    %15 = arith.muli %arg0, %c4_i32 : i32
    %c4_i32_8 = arith.constant 4 : i32
    %16 = arith.subi %c4_i32_8, %15 : i32
    %17 = vector.broadcast %16 : i32 to vector<4x4xi32>
    %18 = arith.cmpi slt, %14, %17 : vector<4x4xi32>
    %cst_9 = arith.constant 0.000000e+00 : f32
    %19 = vector.broadcast %cst_9 : f32 to vector<4x4xf32>
    %20 = arith.cmpf ogt, %9, %19 : vector<4x4xf32>
    %21 = arith.andi %18, %20 : vector<4x4xi1>
    %cst_10 = arith.constant 0.000000e+00 : f32
    %22 = vector.broadcast %cst_10 : f32 to vector<4x4xf32>
    %23 = arith.select %21, %13, %22 : vector<4x4xi1>, vector<4x4xf32>
    %cst_11 = arith.constant dense<0.000000e+00> : vector<4xf32>
    %24 = vector.multi_reduction <add>, %23, %cst_11 [0] : vector<4x4xf32> to vector<4xf32>
    %25 = vector.shape_cast %24 : vector<4xf32> to vector<1x4xf32>
    %26 = vector.shape_cast %25 : vector<1x4xf32> to vector<1x1x4xf32>
    %c0_12 = arith.constant 0 : index
    %c0_13 = arith.constant 0 : index
    %c0_14 = arith.constant 0 : index
    %27 = vector.load %arg4[%c0_12, %c0_13, %c0_14] : memref<1x1x4xf32, #tpu.memory_space<vmem>>, vector<1x1x4xf32>
    tpu.vector_store %arg4[%c0_12, %c0_13, %c0_14], %26 {strides = array<i32>} : memref<1x1x4xf32, #tpu.memory_space<vmem>>, vector<1x1x4xf32>,
    return
  }
  func.func @transform_0(%arg0: i32) -> (i32, i32) {
    %c0_i32 = arith.constant 0 : i32
    %c0_i32_0 = arith.constant 0 : i32
    return %arg0, %c0_i32 : i32, i32
  }
  func.func @transform_1(%arg0: i32) -> (i32, i32) {
    %c0_i32 = arith.constant 0 : i32
    %c0_i32_0 = arith.constant 0 : i32
    return %arg0, %c0_i32 : i32, i32
  }
  func.func @transform_2(%arg0: i32) -> (i32, i32) {
    %c0_i32 = arith.constant 0 : i32
    %c0_i32_0 = arith.constant 0 : i32
    %c0_i32_1 = arith.constant 0 : i32
    return %c0_i32, %c0_i32_0 : i32, i32
  }
  func.func @transform_3(%arg0: i32) -> (i32, i32, i32) {
    %c0_i32 = arith.constant 0 : i32
    %c0_i32_0 = arith.constant 0 : i32
    %c0_i32_1 = arith.constant 0 : i32
    return %arg0, %c0_i32, %c0_i32_0 : i32, i32, i32
  }
}

</mosaic_0001>

<bundles_post_ra>
// kernel: tpu_custom_call.1
= control target key start
LH: loop header
LB: loop body
LE: loop exit
PB: predicated region body
PF: predicated region fallthrough
CT: control target
= control target key end

     0   :  { %v3423_v3 = vmov 0.0|0.0   ;;  %vm3424_vm0 = vmmov 0   ;;  %v3425_v11 = vmov 0.0   ;;  %s4115_s0 = inlined_call_operand.vmem [shape: f32[4,128], index: 0, kind: input, shape index: {}]   ;;  %s4116_s1 = inlined_call_operand.vmem [shape: f32[4,128], index: 1, kind: input, shape index: {}]   ;;  %s4117_s2 = inlined_call_operand.vmem [shape: f32[128,4], index: 2, kind: input, shape index: {}]   ;;  %s4118_s3 = inlined_call_operand.hbm [shape: f32[1,1,4], index: 3, kind: output, shape index: {}]  }
   0x1   :  { %v17_v0 = vld [vmem:[%s4117_s2] sm:$0xff]  ;;  %v18_v1 = vld [vmem:[%s4117_s2 + $0x8] sm:$0xff]  ;;  %v19_v2 = vld [vmem:[%s4117_s2 + $0x10] sm:$0xff]  ;;  %2932 = vmatprep.subr.bf16.mxu1 %v3423_v3  ;;  %3004 = vmatprep.subr.bf16.mxu0 %v3423_v3 }
   0x2   :  { %v35_v4 = vand.u32 4294901760, %v17_v0  ;;  %v38_v5 = vand.u32 4294901760, %v18_v1  ;;  %v3461_v6 = vld [vmem:[%s4117_s2 + $0x18] sm:$0xff]  ;;  %v41_v7 = vand.u32 4294901760, %v19_v2  ;;  %v3467_v9 = vld [vmem:[%s4117_s2 + $0x20] sm:$0xff]  ;;  %v3472_v10 = vld [vmem:[%s4117_s2 + $0x28] sm:$0xff]  ;;  %2334 = vmatprep.mubr.msk.f32.mxu1 %vm3424_vm0, %v3425_v11  ;;  %2439 = vmatprep.mubr.msk.f32.mxu0 %vm3424_vm0, %v3425_v11 }
   0x3   :  { %v44_v8 = vand.u32 4294901760, %v3461_v6  ;;  %v47_v14 = vand.u32 4294901760, %v3467_v9  ;;  %v50_v15 = vand.u32 4294901760, %v3472_v10  ;;  %v3491_v16 = vld [vmem:[%s4117_s2 + $0x30] sm:$0xff]  ;;  %v3496_v17 = vld [vmem:[%s4117_s2 + $0x38] sm:$0xff] }
   0x4   :  { %v3478_v12 = vpack.c.bf16 %v38_v5, %v35_v4 }
   0x5   :  { %v3482_v13 = vpack.c.bf16 %v44_v8, %v41_v7 }
   0x6   :  { %2934 = vmatpush3.bf16.msra.mxu1 %v3478_v12  ;;  %3006 = vmatpush3.bf16.msra.mxu0 %v3478_v12 }
   0x7   :  { %2935 = vmatprep.subr.bf16.mxu1 %v3423_v3  ;;  %3007 = vmatprep.subr.bf16.mxu0 %v3423_v3 }
   0x8   :  { %8 = vsyncpa [#allocation3], 0  ;;  %v3502_v18 = vpack.c.bf16 %v50_v15, %v47_v14  ;;  %v53_v19 = vand.u32 4294901760, %v3491_v16  ;;  %v56_v20 = vand.u32 4294901760, %v3496_v17  ;;  %v3509_v21 = vld [vmem:[%s4115_s0] sm:$0xf]  ;;  %v3565_v36 = vsub.f32 %v17_v0, %v35_v4 }
   0x9   :  { %v3516_v22 = vld [vmem:[%s4117_s2 + $0x40] sm:$0xff]  ;;  %v3521_v23 = vld [vmem:[%s4117_s2 + $0x48] sm:$0xff]  ;;  %v33_v24 = vmul.f32 %v3509_v21, %v3509_v21  ;;  %v3534_v28 = vld [vmem:[%s4117_s2 + $0x50] sm:$0xff]  ;;  %v3567_v37 = vsub.f32 %v18_v1, %v38_v5  ;;  %v3581_v42 = vsub.f32 %v19_v2, %v41_v7  ;;  %v3599_v47 = vsub.f32 %v3461_v6, %v44_v8 }
   0xa   :  { %2937 = vmatpush3.bf16.msra.mxu1 %v3482_v13  ;;  %3009 = vmatpush3.bf16.msra.mxu0 %v3482_v13  ;;  %v3527_v25 = vpack.c.bf16 %v56_v20, %v53_v19  ;;  %v59_v26 = vand.u32 4294901760, %v3516_v22  ;;  %v62_v27 = vand.u32 4294901760, %v3521_v23  ;;  %v3541_v29 = vld [vmem:[%s4117_s2 + $0x58] sm:$0xff]  ;;  %v65_v30 = vand.u32 4294901760, %v3534_v28  ;;  %v3558_v34 = vld [vmem:[%s4117_s2 + $0x60] sm:$0xff]  ;;  %v3563_v35 = vld [vmem:[%s4117_s2 + $0x68] sm:$0xff] }
   0xb   :  { %2938 = vmatprep.subr.bf16.mxu1 %v3423_v3  ;;  %3010 = vmatprep.subr.bf16.mxu0 %v3423_v3  ;;  %v3544_v31 = vand.u32 4294901760, %v33_v24  ;;  %v68_v33 = vand.u32 4294901760, %v3541_v29  ;;  %v71_v38 = vand.u32 4294901760, %v3558_v34  ;;  %v74_v39 = vand.u32 4294901760, %v3563_v35  ;;  %v3576_v40 = vld [vmem:[%s4117_s2 + $0x70] sm:$0xff]  ;;  %v3594_v44 = vld [vmem:[%s4117_s2 + $0x78] sm:$0xff] }
   0xc   :  { %v3552_v32 = vpack.c.bf16 %v62_v27, %v59_v26  ;;  %v128_v45 = vand.u32 4294901760, %v3565_v36  ;;  %v135_v46 = vand.u32 4294901760, %v3567_v37  ;;  %v77_v48 = vand.u32 4294901760, %v3576_v40 }
   0xd   :  { %v3579_v41 = vsub.f32 %v33_v24, %v3544_v31  ;;  %v3589_v43 = vpack.c.bf16 %v68_v33, %v65_v30  ;;  %v3605_v49 = vsub.f32 %v3467_v9, %v47_v14  ;;  %v3611_v50 = vpack.c.bf16 %v74_v39, %v71_v38 }
   0xe   :  { %2940 = vmatpush3.bf16.msra.mxu1 %v3502_v18  ;;  %3012 = vmatpush3.bf16.msra.mxu0 %v3502_v18  ;;  %v80_v51 = vand.u32 4294901760, %v3594_v44  ;;  %v142_v53 = vand.u32 4294901760, %v3581_v42  ;;  %v129_v54 = vsub.f32 %v3565_v36, %v128_v45  ;;  %v136_v55 = vsub.f32 %v3567_v37, %v135_v46 }
   0xf   :  { %2941 = vmatprep.subr.bf16.mxu1 %v3423_v3  ;;  %3013 = vmatprep.subr.bf16.mxu0 %v3423_v3  ;;  %v117_v52 = vand.u32 4294901760, %v3579_v41  ;;  %v149_v56 = vand.u32 4294901760, %v3599_v47  ;;  %v3624_v57 = vsub.f32 %v3472_v10, %v50_v15  ;;  %v156_v58 = vand.u32 4294901760, %v3605_v49 }
  0x10   :  { %v3630_v59 = vsub.f32 %v3491_v16, %v53_v19  ;;  %v3636_v60 = vpack.c.bf16 %v80_v51, %v77_v48  ;;  %v143_v62 = vsub.f32 %v3581_v42, %v142_v53  ;;  %v3641_v63 = vsub.f32 %v3496_v17, %v56_v20 }
  0x11   :  { %v118_v61 = vsub.f32 %v3579_v41, %v117_v52  ;;  %v130_v0 = vand.u32 4294901760, %v129_v54  ;;  %v137_v1 = vand.u32 4294901760, %v136_v55  ;;  %v150_v2 = vsub.f32 %v3599_v47, %v149_v56 }
  0x12   :  { %2943 = vmatpush3.bf16.msra.mxu1 %v3527_v25  ;;  %3015 = vmatpush3.bf16.msra.mxu0 %v3527_v25  ;;  %v163_v4 = vand.u32 4294901760, %v3624_v57  ;;  %v3649_v5 = vpack.c.bf16 %v135_v46, %v128_v45  ;;  %v157_v6 = vsub.f32 %v3605_v49, %v156_v58  ;;  %v170_v7 = vand.u32 4294901760, %v3630_v59 }
  0x13   :  { %2944 = vmatprep.subr.bf16.mxu1 %v3423_v3  ;;  %3016 = vmatprep.subr.bf16.mxu0 %v3423_v3  ;;  %v119_v8 = vand.u32 4294901760, %v118_v61  ;;  %v177_v9 = vand.u32 4294901760, %v3641_v63  ;;  %v3657_v10 = vsub.f32 %v3516_v22, %v59_v26  ;;  %v3662_v14 = vsub.f32 %v3521_v23, %v62_v27 }
  0x14   :  { %v3666_v15 = vpack.c.bf16 %v137_v1, %v130_v0  ;;  %v144_v16 = vand.u32 4294901760, %v143_v62  ;;  %v151_v17 = vand.u32 4294901760, %v150_v2  ;;  %v164_v19 = vsub.f32 %v3624_v57, %v163_v4 }
  0x15   :  { %v171_v20 = vsub.f32 %v3630_v59, %v170_v7  ;;  %v3675_v22 = vsub.f32 %v3534_v28, %v65_v30  ;;  %v178_v23 = vsub.f32 %v3641_v63, %v177_v9  ;;  %v184_v24 = vand.u32 4294901760, %v3657_v10 }
  0x16   :  { %2946 = vmatpush3.bf16.msra.mxu1 %v3552_v32  ;;  %3018 = vmatpush3.bf16.msra.mxu0 %v3552_v32  ;;  %v191_v26 = vand.u32 4294901760, %v3662_v14  ;;  %v3683_v27 = vsub.f32 %v3541_v29, %v68_v33  ;;  %v3687_v45 = vpack.c.bf16 %v151_v17, %v144_v16  ;;  %v3689_v28 = vpack.c.bf16 %v149_v56, %v142_v53 }
  0x17   :  { %2947 = vmatprep.subr.bf16.mxu1 %v3423_v3  ;;  %3019 = vmatprep.subr.bf16.mxu0 %v3423_v3  ;;  %v158_v30 = vand.u32 4294901760, %v157_v6  ;;  %v165_v46 = vand.u32 4294901760, %v164_v19  ;;  %v172_v54 = vand.u32 4294901760, %v171_v20  ;;  %v198_v29 = vand.u32 4294901760, %v3675_v22 }
  0x18   :  { %v179_v33 = vand.u32 4294901760, %v178_v23  ;;  %v185_v53 = vsub.f32 %v3657_v10, %v184_v24  ;;  %v192_v55 = vsub.f32 %v3662_v14, %v191_v26  ;;  %v205_v56 = vand.u32 4294901760, %v3683_v27 }
  0x19   :  { %v3710_v61 = vsub.f32 %v3558_v34, %v71_v38  ;;  %v3715_v62 = vsub.f32 %v3563_v35, %v74_v39  ;;  %v3719_v0 = vpack.c.bf16 %v177_v9, %v170_v7  ;;  %v199_v1 = vsub.f32 %v3675_v22, %v198_v29 }
  0x1a   :  { %2949 = vmatpush3.bf16.msra.mxu1 %v3589_v43  ;;  %3021 = vmatpush3.bf16.msra.mxu0 %v3589_v43  ;;  %v3722_v2 = vpack.c.bf16 %v179_v33, %v172_v54  ;;  %v193_v6 = vand.u32 4294901760, %v192_v55  ;;  %v206_v34 = vsub.f32 %v3683_v27, %v205_v56  ;;  %v3732_v39 = vsub.f32 %v3576_v40, %v77_v48 }
  0x1b   :  { %2950 = vmatprep.subr.bf16.mxu1 %v3423_v3  ;;  %3022 = vmatprep.subr.bf16.mxu0 %v3423_v3  ;;  %v212_v35 = vand.u32 4294901760, %v3710_v61  ;;  %v219_v38 = vand.u32 4294901760, %v3715_v62  ;;  %v3737_v7 = vsub.f32 %v3594_v44, %v80_v51  ;;  %v3743_v9 = vpack.c.bf16 %v191_v26, %v184_v24 }
  0x1c   :  { %v200_v16 = vand.u32 4294901760, %v199_v1  ;;  %v207_v17 = vand.u32 4294901760, %v206_v34  ;;  %v226_v44 = vand.u32 4294901760, %v3732_v39  ;;  %v3755_v20 = vpack.c.bf16 %v205_v56, %v198_v29 }
  0x1d   :  { %v213_v40 = vsub.f32 %v3710_v61, %v212_v35  ;;  %v220_v48 = vsub.f32 %v3715_v62, %v219_v38  ;;  %v233_v51 = vand.u32 4294901760, %v3737_v7  ;;  %v3767_v54 = vpack.c.bf16 %v219_v38, %v212_v35 }
  0x1e   :  { %2952 = vmatpush3.bf16.msra.mxu1 %v3611_v50  ;;  %3024 = vmatpush3.bf16.msra.mxu0 %v3611_v50  ;;  %v3753_v19 = vpack.c.bf16 %v207_v17, %v200_v16  ;;  %v227_v26 = vsub.f32 %v3732_v39, %v226_v44  ;;  %v3783_v56 = vpack.c.bf16 %v3567_v37, %v3565_v36  ;;  %vm1972_vm3 = vcmask 27648  }
  0x1f   :  { %2953 = vmatprep.subr.bf16.mxu1 %v3423_v3  ;;  %3025 = vmatprep.subr.bf16.mxu0 %v3423_v3  ;;  %v214_v23 = vand.u32 4294901760, %v213_v40  ;;  %v221_v24 = vand.u32 4294901760, %v220_v48  ;;  %v3775_v55 = vpack.c.bf16 %v233_v51, %v226_v44  ;;  %v3793_v1 = vpack.c.bf16 %v3599_v47, %v3581_v42 }
  0x20   :  { %v228_v29 = vand.u32 4294901760, %v227_v26  ;;  %v3805_v36 = vpack.c.bf16 %v3624_v57, %v3605_v49  ;;  %v3813_v37 = vpack.c.bf16 %v3641_v63, %v3630_v59  ;;  %v3821_v42 = vpack.c.bf16 %v3662_v14, %v3657_v10 }
  0x21   :  { %v3829_v47 = vpack.c.bf16 %v3683_v27, %v3675_v22  ;;  %v3837_v49 = vpack.c.bf16 %v3715_v62, %v3710_v61  ;;  %v3845_v57 = vpack.c.bf16 %v3737_v7, %v3732_v39  ;;  %vm1980_vm5 = vcmask 24576  }
  0x22   :  { %2955 = vmatpush3.bf16.msra.mxu1 %v3636_v60  ;;  %3027 = vmatpush3.bf16.msra.mxu0 %v3636_v60 }
  0x23   :  { %2956 = vmatprep.subr.bf16.mxu1 %v3423_v3  ;;  %3028 = vmatprep.subr.bf16.mxu0 %v3423_v3 }
  0x25   :  { %2335 = vmatmul.mubr.f32.vlgmr.msra.gmra.mrb[0].mxu1 %v119_v8  ;;  %2440 = vmatmul.mubr.f32.vlgmr.msra.gmra.mrb[0].mxu0 %v117_v52  ;;  %v3693_v52 = vpack.c.bf16 %v163_v4, %v156_v58  ;;  %v3705_v58 = vpack.c.bf16 %v165_v46, %v158_v30  ;;  %v186_v4 = vand.u32 4294901760, %v185_v53  ;;  %v234_v30 = vsub.f32 %v3737_v7, %v233_v51 }
  0x26   :  { %2958 = vmatpush3.bf16.msra.mxu1 %v3666_v15  ;;  %3030 = vmatpush3.bf16.msra.mxu0 %v3649_v5  ;;  %v3765_v46 = vpack.c.bf16 %v221_v24, %v214_v23 }
  0x27   :  { %2959 = vmatprep.subr.bf16.mxu1 %v3423_v3  ;;  %3031 = vmatprep.subr.bf16.mxu0 %v3423_v3  ;;  %v3741_v8 = vpack.c.bf16 %v193_v6, %v186_v4  ;;  %v235_v33 = vand.u32 4294901760, %v234_v30 }
  0x28   :  { %2369 = vmatprep.mubr.msk.f32.mxu1 %vm3424_vm0, %v3425_v11  ;;  %2474 = vmatprep.mubr.msk.f32.mxu0 %vm3424_vm0, %v3425_v11 }
  0x29   :  { %v3773_v53 = vpack.c.bf16 %v235_v33, %v228_v29 }
  0x2a   :  { %2961 = vmatpush3.bf16.msra.mxu1 %v3687_v45  ;;  %3033 = vmatpush3.bf16.msra.mxu0 %v3689_v28 }
  0x2b   :  { %2962 = vmatprep.subr.bf16.mxu1 %v3423_v3  ;;  %3034 = vmatprep.subr.bf16.mxu0 %v3423_v3 }
  0x2e   :  { %2964 = vmatpush3.bf16.msra.mxu1 %v3705_v58  ;;  %3036 = vmatpush3.bf16.msra.mxu0 %v3693_v52 }
  0x2f   :  { %2965 = vmatprep.subr.bf16.mxu1 %v3423_v3  ;;  %3037 = vmatprep.subr.bf16.mxu0 %v3423_v3 }
  0x32   :  { %2967 = vmatpush3.bf16.msra.mxu1 %v3722_v2  ;;  %3039 = vmatpush3.bf16.msra.mxu0 %v3719_v0 }
  0x33   :  { %2968 = vmatprep.subr.bf16.mxu1 %v3423_v3  ;;  %3040 = vmatprep.subr.bf16.mxu0 %v3423_v3 }
  0x36   :  { %2970 = vmatpush3.bf16.msra.mxu1 %v3741_v8  ;;  %3042 = vmatpush3.bf16.msra.mxu0 %v3743_v9 }
  0x37   :  { %2971 = vmatprep.subr.bf16.mxu1 %v3423_v3  ;;  %3043 = vmatprep.subr.bf16.mxu0 %v3423_v3 }
  0x3a   :  { %2973 = vmatpush3.bf16.msra.mxu1 %v3753_v19  ;;  %3045 = vmatpush3.bf16.msra.mxu0 %v3755_v20 }
  0x3b   :  { %2974 = vmatprep.subr.bf16.mxu1 %v3423_v3  ;;  %3046 = vmatprep.subr.bf16.mxu0 %v3423_v3 }
  0x3e   :  { %2976 = vmatpush3.bf16.msra.mxu1 %v3765_v46  ;;  %3048 = vmatpush3.bf16.msra.mxu0 %v3767_v54 }
  0x3f   :  { %2977 = vmatprep.subr.bf16.mxu1 %v3423_v3  ;;  %3049 = vmatprep.subr.bf16.mxu0 %v3423_v3 }
  0x42   :  { %2979 = vmatpush3.bf16.msra.mxu1 %v3773_v53  ;;  %3051 = vmatpush3.bf16.msra.mxu0 %v3775_v55 }
  0x43   :  { %2980 = vmatprep.subr.bf16.mxu1 %v3423_v3  ;;  %3052 = vmatprep.subr.bf16.mxu0 %v3423_v3 }
  0x45   :  { %2370 = vmatmul.mubr.f32.vlgmr.msra.gmra.mrb[0].mxu1 %v3544_v31  ;;  %2475 = vmatmul.mubr.f32.vlgmr.msra.gmra.mrb[0].mxu0 %v3544_v31 }
  0x46   :  { %2982 = vmatpush3.bf16.msra.mxu1 %v3783_v56  ;;  %3054 = vmatpush3.bf16.msra.mxu0 %v3478_v12 }
  0x47   :  { %2983 = vmatprep.subr.bf16.mxu1 %v3423_v3  ;;  %3055 = vmatprep.subr.bf16.mxu0 %v3423_v3 }
  0x48   :  { %2404 = vmatprep.mubr.msk.f32.mxu1 %vm3424_vm0, %v3425_v11  ;;  %2509 = vmatprep.mubr.msk.f32.mxu0 %vm3424_vm0, %v3425_v11 }
  0x4a   :  { %2985 = vmatpush3.bf16.msra.mxu1 %v3793_v1  ;;  %3057 = vmatpush3.bf16.msra.mxu0 %v3482_v13 }
  0x4b   :  { %2986 = vmatprep.subr.bf16.mxu1 %v3423_v3  ;;  %3058 = vmatprep.subr.bf16.mxu0 %v3423_v3 }
  0x4e   :  { %2988 = vmatpush3.bf16.msra.mxu1 %v3805_v36  ;;  %3060 = vmatpush3.bf16.msra.mxu0 %v3502_v18 }
  0x4f   :  { %2989 = vmatprep.subr.bf16.mxu1 %v3423_v3  ;;  %3061 = vmatprep.subr.bf16.mxu0 %v3423_v3 }
  0x52   :  { %2991 = vmatpush3.bf16.msra.mxu1 %v3813_v37  ;;  %3063 = vmatpush3.bf16.msra.mxu0 %v3527_v25 }
  0x53   :  { %2992 = vmatprep.subr.bf16.mxu1 %v3423_v3  ;;  %3064 = vmatprep.subr.bf16.mxu0 %v3423_v3 }
  0x56   :  { %2994 = vmatpush3.bf16.msra.mxu1 %v3821_v42  ;;  %3066 = vmatpush3.bf16.msra.mxu0 %v3552_v32 }
  0x57   :  { %2995 = vmatprep.subr.bf16.mxu1 %v3423_v3  ;;  %3067 = vmatprep.subr.bf16.mxu0 %v3423_v3 }
  0x5a   :  { %2997 = vmatpush3.bf16.msra.mxu1 %v3829_v47  ;;  %3069 = vmatpush3.bf16.msra.mxu0 %v3589_v43 }
  0x5b   :  { %2998 = vmatprep.subr.bf16.mxu1 %v3423_v3  ;;  %3070 = vmatprep.subr.bf16.mxu0 %v3423_v3 }
  0x5e   :  { %3000 = vmatpush3.bf16.msra.mxu1 %v3837_v49  ;;  %3072 = vmatpush3.bf16.msra.mxu0 %v3611_v50 }
  0x5f   :  { %3001 = vmatprep.subr.bf16.mxu1 %v3423_v3  ;;  %3073 = vmatprep.subr.bf16.mxu0 %v3423_v3 }
  0x62   :  { %3003 = vmatpush3.bf16.msra.mxu1 %v3845_v57  ;;  %3075 = vmatpush3.bf16.msra.mxu0 %v3636_v60 }
  0x63   :  { %3076 = vmatprep.subr.bf16.mxu1 %v3423_v3  ;;  %3220 = vmatprep.subr.bf16.mxu0 %v3423_v3 }
  0x65   :  { %2405 = vmatmul.mubr.f32.vlgmr.msra.gmra.mrb[0].mxu1 %v3579_v41  ;;  %2510 = vmatmul.mubr.f32.vlgmr.msra.gmra.mrb[0].mxu0 %v3544_v31  ;;  %v16_v41 = vld [vmem:[%s4116_s1] sm:$0xf]  ;;  %s3426_s1 = smov [#allocation2]  }
  0x66   :  { %3078 = vmatpush3.bf16.msra.mxu1 %v3478_v12  ;;  %3222 = vmatpush3.bf16.msra.mxu0 %v3478_v12  ;;  %v1317_v31 = vmul.f32 %v16_v41, %v3509_v21  ;;  %v675_v59 = vmul.f32 %v16_v41, %v16_v41  ;;  %s1988_s19 = sshll.u32 %s3426_s1, 4  ;;  %s1989_s19 = int_to_ptr.vmem [resolvable:$true] %s1988_s19 }
  0x67   :  { %3079 = vmatprep.subr.bf16.mxu1 %v3423_v3  ;;  %3223 = vmatprep.subr.bf16.mxu0 %v3423_v3  ;;  %s3399_s20 = scalar_lea.vmem %s1989_s19, 16  ;;  %s3403_s21 = scalar_lea.vmem %s1989_s19, 32 }
  0x68   :  { %2544 = vmatprep.mubr.msk.f32.mxu1 %vm3424_vm0, %v3425_v11  ;;  %2754 = vmatprep.mubr.msk.f32.mxu0 %vm3424_vm0, %v3425_v11  ;;  %v3875_v63 = vand.u32 4294901760, %v1317_v31  ;;  %v3877_v10 = vand.u32 4294901760, %v675_v59  ;;  %p3400_p0 = scmp.ne.s32.totalorder %s1989_s19, %s3399_s20  ;;  %p3404_p1 = scmp.lt.s32.totalorder %s1989_s19, %s1989_s19 }
  0x69   :  { %p3405_p2 = scmp.lt.s32.totalorder %s3403_s21, %s3399_s20 }
  0x6a   :  { %3081 = vmatpush3.bf16.msra.mxu1 %v3482_v13  ;;  %3225 = vmatpush3.bf16.msra.mxu0 %v3482_v13  ;;  %v3884_v21 = vsub.f32 %v675_v59, %v3877_v10  ;;  %v3887_v14 = vsub.f32 %v1317_v31, %v3875_v63 }
  0x6b   :  { %3082 = vmatprep.subr.bf16.mxu1 %v3423_v3  ;;  %3226 = vmatprep.subr.bf16.mxu0 %v3423_v3  ;;  %p3406_p3 = por %p3405_p2, %p3404_p1 }
  0x6c   :  { %v759_v22 = vand.u32 4294901760, %v3884_v21  ;;  %v1401_v27 = vand.u32 4294901760, %v3887_v14 }
  0x6d   :  { %p3407_p4 = pnand %p3406_p3, %p3400_p0 }
  0x6e   :  { %3084 = vmatpush3.bf16.msra.mxu1 %v3502_v18  ;;  %3228 = vmatpush3.bf16.msra.mxu0 %v3502_v18  ;;  %v760_v61 = vsub.f32 %v3884_v21, %v759_v22  ;;  %v1402_v62 = vsub.f32 %v3887_v14, %v1401_v27 }
  0x6f   :  { %3085 = vmatprep.subr.bf16.mxu1 %v3423_v3  ;;  %3229 = vmatprep.subr.bf16.mxu0 %v3423_v3 }
  0x70   :  { %v761_v4 = vand.u32 4294901760, %v760_v61  ;;  %v1403_v6 = vand.u32 4294901760, %v1402_v62 }
  0x72   :  { %3087 = vmatpush3.bf16.msra.mxu1 %v3527_v25  ;;  %3231 = vmatpush3.bf16.msra.mxu0 %v3527_v25 }
  0x73   :  { %3088 = vmatprep.subr.bf16.mxu1 %v3423_v3  ;;  %3232 = vmatprep.subr.bf16.mxu0 %v3423_v3 }
  0x76   :  { %3090 = vmatpush3.bf16.msra.mxu1 %v3552_v32  ;;  %3234 = vmatpush3.bf16.msra.mxu0 %v3552_v32 }
  0x77   :  { %3091 = vmatprep.subr.bf16.mxu1 %v3423_v3  ;;  %3235 = vmatprep.subr.bf16.mxu0 %v3423_v3 }
  0x7a   :  { %3093 = vmatpush3.bf16.msra.mxu1 %v3589_v43  ;;  %3237 = vmatpush3.bf16.msra.mxu0 %v3589_v43 }
  0x7b   :  { %3094 = vmatprep.subr.bf16.mxu1 %v3423_v3  ;;  %3238 = vmatprep.subr.bf16.mxu0 %v3423_v3 }
  0x7e   :  { %3096 = vmatpush3.bf16.msra.mxu1 %v3611_v50  ;;  %3240 = vmatpush3.bf16.msra.mxu0 %v3611_v50 }
  0x7f   :  { %3097 = vmatprep.subr.bf16.mxu1 %v3423_v3  ;;  %3241 = vmatprep.subr.bf16.mxu0 %v3423_v3 }
  0x82   :  { %3099 = vmatpush3.bf16.msra.mxu1 %v3636_v60  ;;  %3243 = vmatpush3.bf16.msra.mxu0 %v3636_v60 }
  0x83   :  { %3100 = vmatprep.subr.bf16.mxu1 %v3423_v3  ;;  %3244 = vmatprep.subr.bf16.mxu0 %v3423_v3 }
  0x85   :  { %2545 = vmatmul.mubr.f32.vlgmr.msra.gmra.mrb[2].mxu1 %v761_v4  ;;  %2755 = vmatmul.mubr.f32.vlgmr.msra.gmra.mrb[2].mxu0 %v1403_v6 }
  0x86   :  { %3102 = vmatpush3.bf16.msra.mxu1 %v3666_v15  ;;  %3246 = vmatpush3.bf16.msra.mxu0 %v3666_v15 }
  0x87   :  { %3103 = vmatprep.subr.bf16.mxu1 %v3423_v3  ;;  %3247 = vmatprep.subr.bf16.mxu0 %v3423_v3 }
  0x88   :  { %2579 = vmatprep.mubr.msk.f32.mxu1 %vm3424_vm0, %v3425_v11  ;;  %2789 = vmatprep.mubr.msk.f32.mxu0 %vm3424_vm0, %v3425_v11 }
  0x8a   :  { %3105 = vmatpush3.bf16.msra.mxu1 %v3687_v45  ;;  %3249 = vmatpush3.bf16.msra.mxu0 %v3687_v45 }
  0x8b   :  { %3106 = vmatprep.subr.bf16.mxu1 %v3423_v3  ;;  %3250 = vmatprep.subr.bf16.mxu0 %v3423_v3 }
  0x8e   :  { %3108 = vmatpush3.bf16.msra.mxu1 %v3705_v58  ;;  %3252 = vmatpush3.bf16.msra.mxu0 %v3705_v58 }
  0x8f   :  { %3109 = vmatprep.subr.bf16.mxu1 %v3423_v3  ;;  %3253 = vmatprep.subr.bf16.mxu0 %v3423_v3 }
  0x92   :  { %3111 = vmatpush3.bf16.msra.mxu1 %v3722_v2  ;;  %3255 = vmatpush3.bf16.msra.mxu0 %v3722_v2 }
  0x93   :  { %3112 = vmatprep.subr.bf16.mxu1 %v3423_v3  ;;  %3256 = vmatprep.subr.bf16.mxu0 %v3423_v3 }
  0x96   :  { %3114 = vmatpush3.bf16.msra.mxu1 %v3741_v8  ;;  %3258 = vmatpush3.bf16.msra.mxu0 %v3741_v8 }
  0x97   :  { %3115 = vmatprep.subr.bf16.mxu1 %v3423_v3  ;;  %3259 = vmatprep.subr.bf16.mxu0 %v3423_v3 }
  0x9a   :  { %3117 = vmatpush3.bf16.msra.mxu1 %v3753_v19  ;;  %3261 = vmatpush3.bf16.msra.mxu0 %v3753_v19 }
  0x9b   :  { %3118 = vmatprep.subr.bf16.mxu1 %v3423_v3  ;;  %3262 = vmatprep.subr.bf16.mxu0 %v3423_v3 }
  0x9e   :  { %3120 = vmatpush3.bf16.msra.mxu1 %v3765_v46  ;;  %3264 = vmatpush3.bf16.msra.mxu0 %v3765_v46 }
  0x9f   :  { %3121 = vmatprep.subr.bf16.mxu1 %v3423_v3  ;;  %3265 = vmatprep.subr.bf16.mxu0 %v3423_v3 }
  0xa2   :  { %3123 = vmatpush3.bf16.msra.mxu1 %v3773_v53  ;;  %3267 = vmatpush3.bf16.msra.mxu0 %v3773_v53 }
  0xa3   :  { %3124 = vmatprep.subr.bf16.mxu1 %v3423_v3  ;;  %3268 = vmatprep.subr.bf16.mxu0 %v3423_v3 }
  0xa5   :  { %2580 = vmatmul.mubr.f32.vlgmr.msra.gmra.mrb[2].mxu1 %v3877_v10  ;;  %2790 = vmatmul.mubr.f32.vlgmr.msra.gmra.mrb[2].mxu0 %v3875_v63 }
  0xa6   :  { %3126 = vmatpush3.bf16.msra.mxu1 %v3783_v56  ;;  %3270 = vmatpush3.bf16.msra.mxu0 %v3783_v56 }
  0xa7   :  { %3127 = vmatprep.subr.bf16.mxu1 %v3423_v3  ;;  %3271 = vmatprep.subr.bf16.mxu0 %v3423_v3 }
  0xa8   :  { %2614 = vmatprep.mubr.msk.f32.mxu1 %vm3424_vm0, %v3425_v11  ;;  %2824 = vmatprep.mubr.msk.f32.mxu0 %vm3424_vm0, %v3425_v11 }
  0xaa   :  { %3129 = vmatpush3.bf16.msra.mxu1 %v3793_v1  ;;  %3273 = vmatpush3.bf16.msra.mxu0 %v3793_v1 }
  0xab   :  { %3130 = vmatprep.subr.bf16.mxu1 %v3423_v3  ;;  %3274 = vmatprep.subr.bf16.mxu0 %v3423_v3 }
  0xae   :  { %3132 = vmatpush3.bf16.msra.mxu1 %v3805_v36  ;;  %3276 = vmatpush3.bf16.msra.mxu0 %v3805_v36 }
  0xaf   :  { %3133 = vmatprep.subr.bf16.mxu1 %v3423_v3  ;;  %3277 = vmatprep.subr.bf16.mxu0 %v3423_v3 }
  0xb2   :  { %3135 = vmatpush3.bf16.msra.mxu1 %v3813_v37  ;;  %3279 = vmatpush3.bf16.msra.mxu0 %v3813_v37 }
  0xb3   :  { %3136 = vmatprep.subr.bf16.mxu1 %v3423_v3  ;;  %3280 = vmatprep.subr.bf16.mxu0 %v3423_v3 }
  0xb6   :  { %3138 = vmatpush3.bf16.msra.mxu1 %v3821_v42  ;;  %3282 = vmatpush3.bf16.msra.mxu0 %v3821_v42 }
  0xb7   :  { %3139 = vmatprep.subr.bf16.mxu1 %v3423_v3  ;;  %3283 = vmatprep.subr.bf16.mxu0 %v3423_v3 }
  0xba   :  { %3141 = vmatpush3.bf16.msra.mxu1 %v3829_v47  ;;  %3285 = vmatpush3.bf16.msra.mxu0 %v3829_v47 }
  0xbb   :  { %3142 = vmatprep.subr.bf16.mxu1 %v3423_v3  ;;  %3286 = vmatprep.subr.bf16.mxu0 %v3423_v3 }
  0xbe   :  { %3144 = vmatpush3.bf16.msra.mxu1 %v3837_v49  ;;  %3288 = vmatpush3.bf16.msra.mxu0 %v3837_v49 }
  0xbf   :  { %3145 = vmatprep.subr.bf16.mxu1 %v3423_v3  ;;  %3289 = vmatprep.subr.bf16.mxu0 %v3423_v3 }
  0xc2   :  { %3147 = vmatpush3.bf16.msra.mxu1 %v3845_v57  ;;  %3291 = vmatpush3.bf16.msra.mxu0 %v3845_v57 }
  0xc3   :  { %3148 = vmatprep.subr.bf16.mxu1 %v3423_v3  ;;  %3292 = vmatprep.subr.bf16.mxu0 %v3423_v3 }
  0xc5   :  { %2615 = vmatmul.mubr.f32.vlgmr.msra.gmra.mrb[2].mxu1 %v3884_v21  ;;  %2825 = vmatmul.mubr.f32.vlgmr.msra.gmra.mrb[2].mxu0 %v3887_v14 }
  0xc6   :  { %3150 = vmatpush3.bf16.msra.mxu1 %v3478_v12  ;;  %3294 = vmatpush3.bf16.msra.mxu0 %v3478_v12 }
  0xc7   :  { %3151 = vmatprep.subr.bf16.mxu1 %v3423_v3  ;;  %3295 = vmatprep.subr.bf16.mxu0 %v3423_v3 }
  0xc8   :  { %2649 = vmatprep.mubr.msk.f32.mxu1 %vm3424_vm0, %v3425_v11  ;;  %2859 = vmatprep.mubr.msk.f32.mxu0 %vm3424_vm0, %v3425_v11 }
  0xca   :  { %3153 = vmatpush3.bf16.msra.mxu1 %v3482_v13  ;;  %3297 = vmatpush3.bf16.msra.mxu0 %v3482_v13 }
  0xcb   :  { %3154 = vmatprep.subr.bf16.mxu1 %v3423_v3  ;;  %3298 = vmatprep.subr.bf16.mxu0 %v3423_v3 }
  0xce   :  { %3156 = vmatpush3.bf16.msra.mxu1 %v3502_v18  ;;  %3300 = vmatpush3.bf16.msra.mxu0 %v3502_v18 }
  0xcf   :  { %3157 = vmatprep.subr.bf16.mxu1 %v3423_v3  ;;  %3301 = vmatprep.subr.bf16.mxu0 %v3423_v3 }
  0xd2   :  { %3159 = vmatpush3.bf16.msra.mxu1 %v3527_v25  ;;  %3303 = vmatpush3.bf16.msra.mxu0 %v3527_v25 }
  0xd3   :  { %3160 = vmatprep.subr.bf16.mxu1 %v3423_v3  ;;  %3304 = vmatprep.subr.bf16.mxu0 %v3423_v3 }
  0xd6   :  { %3162 = vmatpush3.bf16.msra.mxu1 %v3552_v32  ;;  %3306 = vmatpush3.bf16.msra.mxu0 %v3552_v32 }
  0xd7   :  { %3163 = vmatprep.subr.bf16.mxu1 %v3423_v3  ;;  %3307 = vmatprep.subr.bf16.mxu0 %v3423_v3 }
  0xda   :  { %3165 = vmatpush3.bf16.msra.mxu1 %v3589_v43  ;;  %3309 = vmatpush3.bf16.msra.mxu0 %v3589_v43 }
  0xdb   :  { %3166 = vmatprep.subr.bf16.mxu1 %v3423_v3  ;;  %3310 = vmatprep.subr.bf16.mxu0 %v3423_v3 }
  0xde   :  { %3168 = vmatpush3.bf16.msra.mxu1 %v3611_v50  ;;  %3312 = vmatpush3.bf16.msra.mxu0 %v3611_v50 }
  0xdf   :  { %3169 = vmatprep.subr.bf16.mxu1 %v3423_v3  ;;  %3313 = vmatprep.subr.bf16.mxu0 %v3423_v3 }
  0xe2   :  { %3171 = vmatpush3.bf16.msra.mxu1 %v3636_v60  ;;  %3315 = vmatpush3.bf16.msra.mxu0 %v3636_v60 }
  0xe3   :  { %3172 = vmatprep.subr.bf16.mxu1 %v3423_v3  ;;  %3316 = vmatprep.subr.bf16.mxu0 %v3423_v3 }
  0xe5   :  { %2650 = vmatmul.mubr.f32.vlgmr.msra.gmra.mrb[2].mxu1 %v759_v22  ;;  %2860 = vmatmul.mubr.f32.vlgmr.msra.gmra.mrb[2].mxu0 %v1401_v27 }
  0xe6   :  { %3174 = vmatpush3.bf16.msra.mxu1 %v3649_v5  ;;  %3318 = vmatpush3.bf16.msra.mxu0 %v3649_v5 }
  0xe7   :  { %3175 = vmatprep.subr.bf16.mxu1 %v3423_v3  ;;  %3319 = vmatprep.subr.bf16.mxu0 %v3423_v3 }
  0xe8   :  { %2684 = vmatprep.mubr.msk.f32.mxu1 %vm3424_vm0, %v3425_v11  ;;  %2894 = vmatprep.mubr.msk.f32.mxu0 %vm3424_vm0, %v3425_v11 }
  0xea   :  { %3177 = vmatpush3.bf16.msra.mxu1 %v3689_v28  ;;  %3321 = vmatpush3.bf16.msra.mxu0 %v3689_v28 }
  0xeb   :  { %3178 = vmatprep.subr.bf16.mxu1 %v3423_v3  ;;  %3322 = vmatprep.subr.bf16.mxu0 %v3423_v3 }
  0xee   :  { %3180 = vmatpush3.bf16.msra.mxu1 %v3693_v52  ;;  %3324 = vmatpush3.bf16.msra.mxu0 %v3693_v52 }
  0xef   :  { %3181 = vmatprep.subr.bf16.mxu1 %v3423_v3  ;;  %3325 = vmatprep.subr.bf16.mxu0 %v3423_v3 }
  0xf2   :  { %3183 = vmatpush3.bf16.msra.mxu1 %v3719_v0  ;;  %3327 = vmatpush3.bf16.msra.mxu0 %v3719_v0 }
  0xf3   :  { %3184 = vmatprep.subr.bf16.mxu1 %v3423_v3  ;;  %3328 = vmatprep.subr.bf16.mxu0 %v3423_v3 }
  0xf6   :  { %3186 = vmatpush3.bf16.msra.mxu1 %v3743_v9  ;;  %3330 = vmatpush3.bf16.msra.mxu0 %v3743_v9 }
  0xf7   :  { %3187 = vmatprep.subr.bf16.mxu1 %v3423_v3  ;;  %3331 = vmatprep.subr.bf16.mxu0 %v3423_v3 }
  0xfa   :  { %3189 = vmatpush3.bf16.msra.mxu1 %v3755_v20  ;;  %3333 = vmatpush3.bf16.msra.mxu0 %v3755_v20 }
  0xfb   :  { %3190 = vmatprep.subr.bf16.mxu1 %v3423_v3  ;;  %3334 = vmatprep.subr.bf16.mxu0 %v3423_v3 }
  0xfe   :  { %3192 = vmatpush3.bf16.msra.mxu1 %v3767_v54  ;;  %3336 = vmatpush3.bf16.msra.mxu0 %v3767_v54 }
  0xff   :  { %3193 = vmatprep.subr.bf16.mxu1 %v3423_v3  ;;  %3337 = vmatprep.subr.bf16.mxu0 %v3423_v3 }
 0x102   :  { %3195 = vmatpush3.bf16.msra.mxu1 %v3775_v55  ;;  %3339 = vmatpush3.bf16.msra.mxu0 %v3775_v55 }
 0x103   :  { %3196 = vmatprep.subr.bf16.mxu1 %v3423_v3  ;;  %3340 = vmatprep.subr.bf16.mxu0 %v3423_v3 }
 0x105   :  { %2685 = vmatmul.mubr.f32.vlgmr.msra.gmra.mrb[2].mxu1 %v3877_v10  ;;  %2895 = vmatmul.mubr.f32.vlgmr.msra.gmra.mrb[2].mxu0 %v3875_v63 }
 0x106   :  { %3198 = vmatpush3.bf16.msra.mxu1 %v3478_v12  ;;  %3342 = vmatpush3.bf16.msra.mxu0 %v3478_v12 }
 0x107   :  { %3199 = vmatprep.subr.bf16.mxu1 %v3423_v3  ;;  %3343 = vmatprep.subr.bf16.mxu0 %v3423_v3 }
 0x108   :  { %2719 = vmatprep.mubr.msk.f32.mxu1 %vm3424_vm0, %v3425_v11  ;;  %2929 = vmatprep.mubr.msk.f32.mxu0 %vm3424_vm0, %v3425_v11 }
 0x10a   :  { %3201 = vmatpush3.bf16.msra.mxu1 %v3482_v13  ;;  %3345 = vmatpush3.bf16.msra.mxu0 %v3482_v13 }
 0x10b   :  { %3202 = vmatprep.subr.bf16.mxu1 %v3423_v3  ;;  %3346 = vmatprep.subr.bf16.mxu0 %v3423_v3 }
 0x10e   :  { %3204 = vmatpush3.bf16.msra.mxu1 %v3502_v18  ;;  %3348 = vmatpush3.bf16.msra.mxu0 %v3502_v18 }
 0x10f   :  { %3205 = vmatprep.subr.bf16.mxu1 %v3423_v3  ;;  %3349 = vmatprep.subr.bf16.mxu0 %v3423_v3 }
 0x112   :  { %3207 = vmatpush3.bf16.msra.mxu1 %v3527_v25  ;;  %3351 = vmatpush3.bf16.msra.mxu0 %v3527_v25 }
 0x113   :  { %3208 = vmatprep.subr.bf16.mxu1 %v3423_v3  ;;  %3352 = vmatprep.subr.bf16.mxu0 %v3423_v3 }
 0x116   :  { %3210 = vmatpush3.bf16.msra.mxu1 %v3552_v32  ;;  %3354 = vmatpush3.bf16.msra.mxu0 %v3552_v32 }
 0x117   :  { %3211 = vmatprep.subr.bf16.mxu1 %v3423_v3  ;;  %3355 = vmatprep.subr.bf16.mxu0 %v3423_v3 }
 0x11a   :  { %3213 = vmatpush3.bf16.msra.mxu1 %v3589_v43  ;;  %3357 = vmatpush3.bf16.msra.mxu0 %v3589_v43 }
 0x11b   :  { %3214 = vmatprep.subr.bf16.mxu1 %v3423_v3  ;;  %3358 = vmatprep.subr.bf16.mxu0 %v3423_v3 }
 0x11e   :  { %3216 = vmatpush3.bf16.msra.mxu1 %v3611_v50  ;;  %3360 = vmatpush3.bf16.msra.mxu0 %v3611_v50 }
 0x11f   :  { %3217 = vmatprep.subr.bf16.mxu1 %v3423_v3  ;;  %3361 = vmatprep.subr.bf16.mxu0 %v3423_v3  ;;  %v1963_v3 = vlaneseq }
 0x121   :  { %v1964_v28 = vshrl.u32 %v1963_v3, 7 }
 0x122   :  { %3219 = vmatpush3.bf16.msra.mxu1 %v3636_v60  ;;  %3363 = vmatpush3.bf16.msra.mxu0 %v3636_v60 }
 0x123   :  { %vm1968_vm2 = vcmp.lt.s32.totalorder %v1964_v28, 4 }
 0x125   :  { %2720 = vmatmul.mubr.f32.vlgmr.msra.gmra.mrb[2].mxu1 %v3877_v10  ;;  %2930 = vmatmul.mubr.f32.vlgmr.msra.gmra.mrb[2].mxu0 %v3875_v63 }
 0x138   :  { %v376_v11 = vpop.f32.mrb[0].mxu1  ;;  %v671_v12 = vpop.f32.mrb[0].mxu0 }
 0x139   :  { %v3364_v13 = vadd.f32 %v671_v12, %v376_v11  ;;  %v2406_v18 = vpop.f32.mrb[1].mxu1  ;;  %v2511_v25 = vpop.f32.mrb[1].mxu0 }
 0x1f8   :  { %v1313_v32 = vpop.f32.mrb[2].mxu1  ;;  %v1955_v43 = vpop.f32.mrb[2].mxu0 }
 0x1f9   :  { %v1959_v50 = vmul.f32 %v3364_v13, %v1313_v32  ;;  %v2721_v5 = vpop.f32.mrb[3].mxu1  ;;  %v2931_v15 = vpop.f32.mrb[3].mxu0 }
 0x1fb   :  { %v1960_v45 = vmax.f32 %v1959_v50, 1e-30  ;;  %vm1969_vm1 = vcmp.gt.f32.partialorder %v1959_v50, 0.0 }
 0x1fc   :  { %vm1970_vm4 = vmand %vm1968_vm2, %vm1969_vm1 }
 0x1fd   :  { %3397 = vrsqrt.f32 %v1960_v45 }
 0x207   :  { %v3398_v60 = vpop.eup %3397 }
 0x208   :  { %v1962_v52 = vmul.f32 %v3398_v60, %v1955_v43 }
 0x20a   :  { %v1971_v58 = vsel %vm1970_vm4, %v1962_v52, 0.0 }
 0x20b   :  { %v1973_v0 = vsel %vm1972_vm3, %v1971_v58, 0.0 }
 0x20c   :  { %v1974_v2 = vrot.slane %v1973_v0, 4 }
 0x20e   :  { %v1975_v34 = vadd.f32 %v1974_v2, %v1973_v0 }
 0x210   :  { %v1976_v35 = vrot.slane %v1975_v34, 2 }
 0x212   :  { %v1977_v38 = vadd.f32 %v1976_v35, %v1975_v34 }
 0x214   :  { %v1978_v39 = vrot.slane %v1977_v38, 1 }
 0x216   :  { %v1979_v7 = vadd.f32 %v1978_v39, %v1977_v38 }
 0x218   :  { %1981 = vst.msk [vmem:[#allocation2] sm:$0x1] %vm1980_vm5, %v1979_v7 }
 0x219   :  { %3410 = shalt.err (!%p3407_p4)
}
 0x21a   :  { %s3411_s24 = scalar_lea.hbm %s4118_s3, 16 }
 0x21b   :  { %p3412_p5 = scmp.ne.s32.totalorder %s4118_s3, %s3411_s24  ;;  %p3415_p6 = scmp.lt.u32.totalorder %s3411_s24, %s4118_s3 }
 0x21d   :  { %p3417_p7 = pnand %p3415_p6, %p3412_p5 }
 0x21f   :  { %3420 = shalt.err (!%p3417_p7)
}
 0x220   :  { %1991 = dma.vmem_to_hbm [thread:$0]  %s1989_s19, 16, %s4118_s3, [#allocation3]  }
 0x221   :  { %3421 = dma.done.wait [#allocation3], 16  }
 0x222   :  { %3422 = vsyncadd [#allocation3], 4294967280 }
 0x223   :  { %1995 = vsyncpa [#allocation3], 1 }

</bundles_post_ra>
